<compile_context>
chip_gen: v6e
topology: v6e:2x2x1
jax: 0.10.0
libtpu: 0.0.40
codegen_flags: <defaults>
</compile_context>

<pallas_src>
import functools
import math

import jax
import jax.numpy as jnp
from jax.experimental import pallas as pl
from jax.experimental.pallas import tpu as pltpu


def _round_up(x: int, m: int) -> int:
    return ((x + m - 1) // m) * m


def _to_seg_kernel(x_ref, wm_ref, b2_ref, w3_ref, b3_ref, out_ref, stack_ref,
                   *, tap_offsets, apron, p_out):
    """Fused ToSEG forward for one batch item.

    Shapes seen by the kernel:
      x_ref    : [1, C_in, L]        zero-padded, flattened, apron-extended image
                                     (act dtype, typically bf16)
      wm_ref   : [1, C_out, 9*C_in]  per-sample modulated 3x3 weight (c2 folded), f32
      b2_ref   : [C_out, 1]          ToSEG bias, f32
      w3_ref   : [NC, C_out]         1x1 conv2 weight, f32
      b3_ref   : [NC, 1]             conv2 bias, f32
      out_ref  : [1, NC, P_out]      output (padded-grid layout, lane-dense)
      stack_ref: VMEM [9*C_in, P_out] f32 scratch -- the in-VMEM tap stack
    """
    c_in = x_ref.shape[1]
    xv = x_ref[0]                                              # [C_in, L]

    # Build the 9 shifted taps by static lane slices inside VMEM (no HBM im2col).
    # Widen to f32 here so the stack stores are (8,128)-tile aligned and the
    # accumulation below is f32.
    for t, s in enumerate(tap_offsets):                        # static unroll (9 taps)
        stack_ref[t * c_in:(t + 1) * c_in, :] = (
            xv[:, apron + s: apron + s + p_out].astype(jnp.float32))

    # One fused K = 9*C_in matmul on the MXU (f32 accumulate).
    h = jnp.dot(wm_ref[0], stack_ref[...],
                preferred_element_type=jnp.float32)            # [C_out, P_out]

    # bias + LeakyReLU(0.2) (f32 epilogue on the VPU)
    h = h + b2_ref[...]
    a = jnp.maximum(h, 0.2 * h)

    # 1x1 conv2 == tiny channel matmul + bias. (K=M=4: negligible MXU work; the kernel
    # is memory-bound so this costs nothing measurable.)
    out = jnp.dot(w3_ref[...], a, preferred_element_type=jnp.float32) + b3_ref[...]
    out_ref[0] = out.astype(out_ref.dtype)


def to_seg_forward(x, w_lat, w1, b1, w2, b2, w3, b3, *, act_dtype=jnp.bfloat16):
    """ToSEG forward. x: [B, C_in, H, W], w_lat: [B, D] -> [B, n_classes, H, W]."""
    B, c_in, H, W = x.shape
    c_out = w2.shape[0]
    n_classes = w3.shape[0]

    # Equalized-lr constants: static Python floats, folded into the wrapper-side
    # weight preparation (no extra device kernels, no host sync).
    c1 = 1.0 / math.sqrt(w1.shape[1])           # 1/sqrt(d_latent)
    c2 = 1.0 / math.sqrt(c_in * 3 * 3)          # 1/sqrt(C_in*3*3)

    # ---- hoisted tiny GEMM (XLA side): style + per-sample modulated conv weight ----
    style = jnp.dot(w_lat, (w1 * c1).T,
                    precision=jax.lax.Precision.HIGHEST) + b1[None, :]   # [B, C_in]
    wmod = (w2 * c2)[None] * style[:, None, :, None, None]   # [B, C_out, C_in, 3, 3]
    wmod = jnp.transpose(wmod, (0, 1, 3, 4, 2)).reshape(B, c_out, 9 * c_in)
    wmod = wmod.astype(jnp.float32)                           # tiny; keep f32

    # ---- activation layout (1x HBM traffic): zero-pad once, flatten, add apron ----
    Hp, Wp = H + 2, W + 2
    P = Hp * Wp                                  # padded-grid pixel count
    p_out = _round_up(P, 128)                    # lane-dense per-image output extent
    apron = Wp + 1                               # max |tap offset|
    L = _round_up(p_out + 2 * apron, 128)        # extended lane extent of x
    xpad = jnp.pad(x, ((0, 0), (0, 0), (1, 1), (1, 1))).reshape(B, c_in, P)
    x_ext = jnp.pad(xpad, ((0, 0), (0, 0), (apron, L - apron - P))).astype(act_dtype)

    # Tap t = (ky, kx): output pixel g (padded grid) reads padded image at g + offset.
    tap_offsets = tuple((ky - 1) * Wp + (kx - 1)
                        for ky in range(3) for kx in range(3))

    b2c = b2.reshape(c_out, 1).astype(jnp.float32)
    w3m = w3.reshape(n_classes, c_out).astype(jnp.float32)
    b3c = b3.reshape(n_classes, 1).astype(jnp.float32)

    kernel = functools.partial(_to_seg_kernel, tap_offsets=tap_offsets,
                               apron=apron, p_out=p_out)

    out = pl.pallas_call(
        kernel,
        out_shape=jax.ShapeDtypeStruct((B, n_classes, p_out), x.dtype),
        grid_spec=pltpu.PrefetchScalarGridSpec(
            num_scalar_prefetch=0,
            grid=(B,),
            in_specs=[
                pl.BlockSpec((1, c_in, L), lambda b: (b, 0, 0)),           # image
                pl.BlockSpec((1, c_out, 9 * c_in), lambda b: (b, 0, 0)),   # modulated W
                pl.BlockSpec((c_out, 1), lambda b: (0, 0)),                # bias
                pl.BlockSpec((n_classes, c_out), lambda b: (0, 0)),        # conv2 W
                pl.BlockSpec((n_classes, 1), lambda b: (0, 0)),            # conv2 bias
            ],
            out_specs=pl.BlockSpec((1, n_classes, p_out), lambda b: (b, 0, 0)),
            scratch_shapes=[pltpu.VMEM((9 * c_in, p_out), jnp.float32)],
        ),
        compiler_params=pltpu.CompilerParams(
            dimension_semantics=("parallel",),   # batch items shard across v7x's 2 TCs
        ),
    )(x_ext, wmod, b2c, w3m, b3c)

    # Strip padded-grid border + lane padding (layout plumbing only).
    out = out[:, :, :P].reshape(B, n_classes, Hp, Wp)[:, :, 1:1 + H, 1:1 + W]
    return out


if __name__ == "__main__":
    # Small ToSEG config: d_latent=32, features=8 (conv out = 4), n_classes=4, 16x16 map.
    B, D_LATENT, FEATURES, N_CLASSES, H, W = 2, 32, 8, 4, 16, 16
    C_OUT = FEATURES // 2

    key = jax.random.PRNGKey(0)
    k1, k2, k3, k4, k5, k6 = jax.random.split(key, 6)
    # Parameters (deterministic; EqualizedWeight params ~ N(0,1), biases as in PyTorch init).
    w1 = jax.random.normal(k1, (FEATURES, D_LATENT), dtype=jnp.float32)        # to_style weight
    b1 = jnp.ones((FEATURES,), dtype=jnp.float32)                              # to_style bias = 1.0
    w2 = jax.random.normal(k2, (C_OUT, FEATURES, 3, 3), dtype=jnp.float32)     # modulated conv weight
    b2 = jnp.zeros((C_OUT,), dtype=jnp.float32)                                # ToSEG.bias
    w3 = 0.25 * jax.random.normal(k3, (N_CLASSES, C_OUT), dtype=jnp.float32)   # conv2 (1x1) weight
    b3 = 0.1 * jax.random.normal(k4, (N_CLASSES,), dtype=jnp.float32)          # conv2 bias
    # Inputs.
    x = jax.random.normal(k5, (B, FEATURES, H, W), dtype=jnp.float32)
    w_lat = jax.random.normal(k6, (B, D_LATENT), dtype=jnp.float32)

    # Pure-JAX reference (HIGHEST precision so the comparison is meaningful).
    PREC = jax.lax.Precision.HIGHEST
    c1 = 1.0 / math.sqrt(D_LATENT)
    c2 = 1.0 / math.sqrt(FEATURES * 3 * 3)
    style = jnp.einsum("bd,fd->bf", w_lat, w1, precision=PREC) * c1 + b1[None, :]
    wmod = (w2 * c2)[None] * style[:, None, :, None, None]       # [B, C_OUT, FEATURES, 3, 3]
    xpad = jnp.pad(x, ((0, 0), (0, 0), (1, 1), (1, 1)))
    h = jnp.zeros((B, C_OUT, H, W), dtype=jnp.float32)
    for ky in range(3):
        for kx in range(3):
            h = h + jnp.einsum("boi,bihw->bohw", wmod[:, :, :, ky, kx],
                               xpad[:, :, ky:ky + H, kx:kx + W], precision=PREC)
    h = h + b2[None, :, None, None]
    a = jnp.where(h >= 0.0, h, 0.2 * h)
    ref = jnp.einsum("ko,bohw->bkhw", w3, a, precision=PREC) + b3[None, :, None, None]

    # f32-activation path: tight check.
    out_f32 = jax.block_until_ready(
        to_seg_forward(x, w_lat, w1, b1, w2, b2, w3, b3, act_dtype=jnp.float32))
    assert out_f32.shape == (B, N_CLASSES, H, W)
    err_f32 = float(jnp.max(jnp.abs(out_f32 - ref)))
    assert jnp.allclose(out_f32, ref, atol=2e-3, rtol=2e-3), f"f32 max abs err {err_f32}"

    # Default bf16-activation path (halves activation HBM traffic): looser tolerance.
    out_bf16 = jax.block_until_ready(
        to_seg_forward(x, w_lat, w1, b1, w2, b2, w3, b3))
    assert out_bf16.shape == (B, N_CLASSES, H, W)
    err_bf16 = float(jnp.max(jnp.abs(out_bf16 - ref)))
    assert jnp.allclose(out_bf16, ref, atol=3e-2, rtol=3e-2), f"bf16 max abs err {err_bf16}"

    print("KERNEL_OK")
</pallas_src>

<mosaic_0001>
module attributes {stable_mosaic.version = 11 : i64} {
  func.func @_to_seg_kernel(%arg0: i32, %arg1: memref<1x8x512xf32, #tpu.memory_space<vmem>>, %arg2: memref<1x4x72xf32, #tpu.memory_space<vmem>>, %arg3: memref<4x1xf32, #tpu.memory_space<vmem>>, %arg4: memref<4x4xf32, #tpu.memory_space<vmem>>, %arg5: memref<4x1xf32, #tpu.memory_space<vmem>>, %arg6: memref<1x4x384xf32, #tpu.memory_space<vmem>>, %arg7: memref<72x384xf32, #tpu.memory_space<vmem>>) attributes {dimension_semantics = [#tpu.dimension_semantics<parallel>], iteration_bounds = array<i64: 2>, scalar_prefetch = 0 : i64, scratch_operands = 1 : i64, tpu.core_type = #tpu.core_type<tc>, window_params = [{transform_indices = @transform_0, window_bounds = array<i64: 1, 8, 512>}, {transform_indices = @transform_1, window_bounds = array<i64: 1, 4, 72>}, {pipeline_mode = #tpu.pipeline_mode<synchronous>, transform_indices = @transform_2, window_bounds = array<i64: 4, 1>}, {pipeline_mode = #tpu.pipeline_mode<synchronous>, transform_indices = @transform_3, window_bounds = array<i64: 4, 4>}, {pipeline_mode = #tpu.pipeline_mode<synchronous>, transform_indices = @transform_4, window_bounds = array<i64: 4, 1>}, {transform_indices = @transform_5, window_bounds = array<i64: 1, 4, 384>}]} {
    %c0 = arith.constant 0 : index
    %c0_0 = arith.constant 0 : index
    %c0_1 = arith.constant 0 : index
    %0 = vector.load %arg1[%c0, %c0_0, %c0_1] : memref<1x8x512xf32, #tpu.memory_space<vmem>>, vector<1x8x512xf32>
    %1 = vector.shape_cast %0 : vector<1x8x512xf32> to vector<8x512xf32>
    %2 = vector.extract_strided_slice %1 {offsets = [0, 0], sizes = [8, 384], strides = [1, 1]} : vector<8x512xf32> to vector<8x384xf32>
    %c0_2 = arith.constant 0 : index
    %c0_3 = arith.constant 0 : index
    %3 = vector.load %arg7[%c0_2, %c0_3] : memref<72x384xf32, #tpu.memory_space<vmem>>, vector<8x384xf32>
    tpu.vector_store %arg7[%c0_2, %c0_3], %2 {strides = array<i32>} : memref<72x384xf32, #tpu.memory_space<vmem>>, vector<8x384xf32>,
    %4 = vector.extract_strided_slice %1 {offsets = [0, 1], sizes = [8, 384], strides = [1, 1]} : vector<8x512xf32> to vector<8x384xf32>
    %c8 = arith.constant 8 : index
    %c0_4 = arith.constant 0 : index
    %5 = vector.load %arg7[%c8, %c0_4] : memref<72x384xf32, #tpu.memory_space<vmem>>, vector<8x384xf32>
    tpu.vector_store %arg7[%c8, %c0_4], %4 {strides = array<i32>} : memref<72x384xf32, #tpu.memory_space<vmem>>, vector<8x384xf32>,
    %6 = vector.extract_strided_slice %1 {offsets = [0, 2], sizes = [8, 384], strides = [1, 1]} : vector<8x512xf32> to vector<8x384xf32>
    %c16 = arith.constant 16 : index
    %c0_5 = arith.constant 0 : index
    %7 = vector.load %arg7[%c16, %c0_5] : memref<72x384xf32, #tpu.memory_space<vmem>>, vector<8x384xf32>
    tpu.vector_store %arg7[%c16, %c0_5], %6 {strides = array<i32>} : memref<72x384xf32, #tpu.memory_space<vmem>>, vector<8x384xf32>,
    %8 = vector.extract_strided_slice %1 {offsets = [0, 18], sizes = [8, 384], strides = [1, 1]} : vector<8x512xf32> to vector<8x384xf32>
    %c24 = arith.constant 24 : index
    %c0_6 = arith.constant 0 : index
    %9 = vector.load %arg7[%c24, %c0_6] : memref<72x384xf32, #tpu.memory_space<vmem>>, vector<8x384xf32>
    tpu.vector_store %arg7[%c24, %c0_6], %8 {strides = array<i32>} : memref<72x384xf32, #tpu.memory_space<vmem>>, vector<8x384xf32>,
    %10 = vector.extract_strided_slice %1 {offsets = [0, 19], sizes = [8, 384], strides = [1, 1]} : vector<8x512xf32> to vector<8x384xf32>
    %c32 = arith.constant 32 : index
    %c0_7 = arith.constant 0 : index
    %11 = vector.load %arg7[%c32, %c0_7] : memref<72x384xf32, #tpu.memory_space<vmem>>, vector<8x384xf32>
    tpu.vector_store %arg7[%c32, %c0_7], %10 {strides = array<i32>} : memref<72x384xf32, #tpu.memory_space<vmem>>, vector<8x384xf32>,
    %12 = vector.extract_strided_slice %1 {offsets = [0, 20], sizes = [8, 384], strides = [1, 1]} : vector<8x512xf32> to vector<8x384xf32>
    %c40 = arith.constant 40 : index
    %c0_8 = arith.constant 0 : index
    %13 = vector.load %arg7[%c40, %c0_8] : memref<72x384xf32, #tpu.memory_space<vmem>>, vector<8x384xf32>
    tpu.vector_store %arg7[%c40, %c0_8], %12 {strides = array<i32>} : memref<72x384xf32, #tpu.memory_space<vmem>>, vector<8x384xf32>,
    %14 = vector.extract_strided_slice %1 {offsets = [0, 36], sizes = [8, 384], strides = [1, 1]} : vector<8x512xf32> to vector<8x384xf32>
    %c48 = arith.constant 48 : index
    %c0_9 = arith.constant 0 : index
    %15 = vector.load %arg7[%c48, %c0_9] : memref<72x384xf32, #tpu.memory_space<vmem>>, vector<8x384xf32>
    tpu.vector_store %arg7[%c48, %c0_9], %14 {strides = array<i32>} : memref<72x384xf32, #tpu.memory_space<vmem>>, vector<8x384xf32>,
    %16 = vector.extract_strided_slice %1 {offsets = [0, 37], sizes = [8, 384], strides = [1, 1]} : vector<8x512xf32> to vector<8x384xf32>
    %c56 = arith.constant 56 : index
    %c0_10 = arith.constant 0 : index
    %17 = vector.load %arg7[%c56, %c0_10] : memref<72x384xf32, #tpu.memory_space<vmem>>, vector<8x384xf32>
    tpu.vector_store %arg7[%c56, %c0_10], %16 {strides = array<i32>} : memref<72x384xf32, #tpu.memory_space<vmem>>, vector<8x384xf32>,
    %18 = vector.extract_strided_slice %1 {offsets = [0, 38], sizes = [8, 384], strides = [1, 1]} : vector<8x512xf32> to vector<8x384xf32>
    %c64 = arith.constant 64 : index
    %c0_11 = arith.constant 0 : index
    %19 = vector.load %arg7[%c64, %c0_11] : memref<72x384xf32, #tpu.memory_space<vmem>>, vector<8x384xf32>
    tpu.vector_store %arg7[%c64, %c0_11], %18 {strides = array<i32>} : memref<72x384xf32, #tpu.memory_space<vmem>>, vector<8x384xf32>,
    %c0_12 = arith.constant 0 : index
    %c0_13 = arith.constant 0 : index
    %c0_14 = arith.constant 0 : index
    %20 = vector.load %arg2[%c0_12, %c0_13, %c0_14] : memref<1x4x72xf32, #tpu.memory_space<vmem>>, vector<1x4x72xf32>
    %21 = vector.shape_cast %20 : vector<1x4x72xf32> to vector<4x72xf32>
    %c0_15 = arith.constant 0 : index
    %c0_16 = arith.constant 0 : index
    %22 = vector.load %arg7[%c0_15, %c0_16] : memref<72x384xf32, #tpu.memory_space<vmem>>, vector<72x384xf32>
    %cst = arith.constant dense<0.000000e+00> : vector<4x384xf32>
    %23 = tpu.matmul %21, %22, %cst {dimension_numbers = #tpu.dot_dimension_numbers<[1], [0], [0], [1], [0, 0, 1, 1], [], []>} : vector<4x72xf32>, vector<72x384xf32>, vector<4x384xf32> -> vector<4x384xf32>
    %c0_17 = arith.constant 0 : index
    %c0_18 = arith.constant 0 : index
    %24 = vector.load %arg3[%c0_17, %c0_18] : memref<4x1xf32, #tpu.memory_space<vmem>>, vector<4x1xf32>
    %25 = vector.broadcast %24 : vector<4x1xf32> to vector<4x384xf32>
    %26 = arith.addf %23, %25 : vector<4x384xf32>
    %cst_19 = arith.constant 2.000000e-01 : f32
    %27 = vector.broadcast %cst_19 : f32 to vector<4x384xf32>
    %28 = arith.mulf %27, %26 : vector<4x384xf32>
    %29 = arith.maximumf %26, %28 : vector<4x384xf32>
    %c0_20 = arith.constant 0 : index
    %c0_21 = arith.constant 0 : index
    %30 = vector.load %arg4[%c0_20, %c0_21] : memref<4x4xf32, #tpu.memory_space<vmem>>, vector<4x4xf32>
    %cst_22 = arith.constant dense<0.000000e+00> : vector<4x384xf32>
    %31 = tpu.matmul %30, %29, %cst_22 {dimension_numbers = #tpu.dot_dimension_numbers<[1], [0], [0], [1], [0, 0, 1, 1], [], []>} : vector<4x4xf32>, vector<4x384xf32>, vector<4x384xf32> -> vector<4x384xf32>
    %c0_23 = arith.constant 0 : index
    %c0_24 = arith.constant 0 : index
    %32 = vector.load %arg5[%c0_23, %c0_24] : memref<4x1xf32, #tpu.memory_space<vmem>>, vector<4x1xf32>
    %33 = vector.broadcast %32 : vector<4x1xf32> to vector<4x384xf32>
    %34 = arith.addf %31, %33 : vector<4x384xf32>
    %c0_25 = arith.constant 0 : index
    %c0_26 = arith.constant 0 : index
    %c0_27 = arith.constant 0 : index
    %35 = vector.load %arg6[%c0_25, %c0_26, %c0_27] : memref<1x4x384xf32, #tpu.memory_space<vmem>>, vector<1x4x384xf32>
    %36 = vector.shape_cast %35 : vector<1x4x384xf32> to vector<4x384xf32>
    %37 = vector.shape_cast %34 : vector<4x384xf32> to vector<1x4x384xf32>
    tpu.vector_store %arg6[%c0_25, %c0_26, %c0_27], %37 {strides = array<i32>} : memref<1x4x384xf32, #tpu.memory_space<vmem>>, vector<1x4x384xf32>,
    return
  }
  func.func @transform_0(%arg0: i32) -> (i32, i32, i32) {
    %c0_i32 = arith.constant 0 : i32
    %c0_i32_0 = arith.constant 0 : i32
    %c0_i32_1 = arith.constant 0 : i32
    return %arg0, %c0_i32, %c0_i32_0 : i32, i32, i32
  }
  func.func @transform_1(%arg0: i32) -> (i32, i32, i32) {
    %c0_i32 = arith.constant 0 : i32
    %c0_i32_0 = arith.constant 0 : i32
    %c0_i32_1 = arith.constant 0 : i32
    return %arg0, %c0_i32, %c0_i32_0 : i32, i32, i32
  }
  func.func @transform_2(%arg0: i32) -> (i32, i32) {
    %c0_i32 = arith.constant 0 : i32
    %c0_i32_0 = arith.constant 0 : i32
    %c0_i32_1 = arith.constant 0 : i32
    return %c0_i32, %c0_i32_0 : i32, i32
  }
  func.func @transform_3(%arg0: i32) -> (i32, i32) {
    %c0_i32 = arith.constant 0 : i32
    %c0_i32_0 = arith.constant 0 : i32
    %c0_i32_1 = arith.constant 0 : i32
    return %c0_i32, %c0_i32_0 : i32, i32
  }
  func.func @transform_4(%arg0: i32) -> (i32, i32) {
    %c0_i32 = arith.constant 0 : i32
    %c0_i32_0 = arith.constant 0 : i32
    %c0_i32_1 = arith.constant 0 : i32
    return %c0_i32, %c0_i32_0 : i32, i32
  }
  func.func @transform_5(%arg0: i32) -> (i32, i32, i32) {
    %c0_i32 = arith.constant 0 : i32
    %c0_i32_0 = arith.constant 0 : i32
    %c0_i32_1 = arith.constant 0 : i32
    return %arg0, %c0_i32, %c0_i32_0 : i32, i32, i32
  }
}

</mosaic_0001>

<bundles_post_ra>
// kernel: tpu_custom_call.1
= control target key start
LH: loop header
LB: loop body
LE: loop exit
PB: predicated region body
PF: predicated region fallthrough
CT: control target
= control target key end

     0   :  { %10 = vsyncpa [#allocation4], 0  ;;  %s1356_s0 = inlined_call_operand.hbm [shape: f32[2,8,512], index: 0, kind: input, shape index: {}]   ;;  %s1357_s1 = inlined_call_operand.vmem [shape: f32[2,4,72], index: 1, kind: input, shape index: {}]   ;;  %s1358_s2 = inlined_call_operand.vmem [shape: f32[4,1], index: 2, kind: input, shape index: {}]   ;;  %s1359_s3 = inlined_call_operand.vmem [shape: f32[4,4], index: 3, kind: input, shape index: {}]   ;;  %s1360_s4 = inlined_call_operand.vmem [shape: f32[4,1], index: 4, kind: input, shape index: {}]   ;;  %s1361_s5 = inlined_call_operand.hbm [shape: f32[2,4,384], index: 5, kind: output, shape index: {}]  }
   0x1   :  { %12 = vsyncpa [#allocation4 + $0x1], 0 }
   0x2   :  { %13 = vsyncpa [#allocation5], 0 }
   0x3   :  { %15 = vsyncpa [#allocation5 + $0x1], 0  ;;  %s1119_s18 = smov 0   ;;  %s1121_s19 = smov 0  }
   0x4   :  { %s1123_s20 = smov 0   ;;  %s1125_s21 = smov 0  }
   0x5 LB: > { %s1140_s22 = sadd.s32 4294967295, %s1074_s21   ;;  %s863_s23 = sadd.s32 4294967294, %s1074_s21   ;;  %s1074_s21 = sphi %s1125_s21, %s1378_s21   ;;  %s1070_s20 = sphi %s1123_s20, %s1377_s20   ;;  %s1066_s19 = sphi %s1121_s19, %s1376_s19   ;;  %s1062_s18 = sphi %s1119_s18, %s1375_s18  }
   0x6   : > { %s1144_s24 = sadd.s32 1, %s1074_s21   ;;  %s28_s25 = sadd.s32 1, %s1070_s20 }
   0x7   : > { %s25_s26 = ssub.s32 %s1074_s21, %s1144_s24  ;;  %p35_p0 = scmp.ne.s32.totalorder %s1070_s20, %s1066_s19 }
   0x8   : > { %p26_p1 = scmp.eq.s32.totalorder %s25_s26, 0  ;;  %p36_p2 = scmp.eq.s32.totalorder %s1074_s21, 0 }
   0x9   : > { %p41_p3 = scmp.ne.s32.totalorder %s1066_s19, %s1062_s18  ;;  %p42_p4 = scmp.eq.s32.totalorder %s1140_s22, 0 }
   0xa   : > { %s1156_s27 = scalar_select %p26_p1, %s1070_s20, %s28_s25  }
   0xb   : > { %p1158_p5 = por %p36_p2, %p35_p0  ;;  %p1162_p6 = por %p42_p4, %p41_p3 }
   0xc   : > { %p154_p7 = scmp.eq.s32.totalorder %s1140_s22, 1  ;;  %p160_p8 = scmp.eq.s32.totalorder %s863_s23, 1 }
   0xd   : > { %s1365_s29 = scalar_select %p1162_p6, 1, 0 }
   0xe   : > { %p935_p10 = scmp.lt.s32.totalorder %s1074_s21, 2  ;;  %p1169_p11 = por %p154_p7, %p35_p0 }
   0xf   : > { %p1173_p12 = por %p160_p8, %p41_p3  ;;  %s189_s7 = sand.u32 1, %s1070_s20  }
  0x10   : > { %s1366_s30 = scalar_select %p1169_p11, 1, 0 }
  0x11   : > { %s1367_s6 = scalar_select %p1173_p12, 1, 0 }
  0x12   : > { %s882_s8 = sshll.u32 %s1074_s21, 9  ;;  %s866_s9 = sshll.u32 %s189_s7, 5 }
  0x13   : > { %s1182_s12 = scalar_lea.hbm %s1356_s0, %s882_s8  ;;  %s193_s13 = scalar_lea.vmem [#allocation3], %s866_s9 }
  0x14   : > { %s201_s14 = sshll.u32 %s193_s13, 4  ;;  %p1186_p13 = pnand %p935_p10, %p1158_p5  ;;  %s1190_s14 = int_to_ptr.vmem [resolvable:$true] %s201_s14 }
  0x15   : > { %s190_s16 = scalar_lea.sflag [#allocation4], %s189_s7  ;;  %s982_s17 = scalar_lea.hbm %s1182_s12, 512 }
  0x16   : > { %p983_p2 = scmp.ne.s32.totalorder %s1182_s12, %s982_s17  ;;  %p984_p3 = pneg %p1186_p13 }
  0x17   : > { %s987_s26 = scalar_lea.hbm %s1356_s0, 1024  ;;  %p988_p5 = scmp.lt.s32.totalorder %s1182_s12, %s1356_s0 }
  0x18   : > { %p985_p4 = pnand %p984_p3, %p983_p2  ;;  %p989_p8 = scmp.lt.s32.totalorder %s987_s26, %s982_s17 }
  0x1a   : > { %p986_p7 = pneg %p985_p4  ;;  %p990_p10 = por %p989_p8, %p988_p5 }
  0x1c   : > { %p991_p9 = pnand %p990_p10, %p986_p7 }
  0x1e   : > { %994 = shalt.err (!%p991_p9)
}
  0x1f   : > { %s995_s7 = scalar_lea.vmem %s1190_s14, 512  ;;  %s1076_s9 = smov [#allocation3]  }
  0x20   : > { %p996_p0 = scmp.ne.s32.totalorder %s1190_s14, %s995_s7  ;;  %s1000_s10 = sshll.u32 %s1076_s9, 4  ;;  %s1001_s10 = int_to_ptr.vmem [resolvable:$false] %s1000_s10 }
  0x21   : > { %s1002_s11 = scalar_lea.vmem %s1001_s10, 1024  ;;  %p1003_p4 = scmp.lt.s32.totalorder %s1190_s14, %s1001_s10 }
  0x22   : > { %p998_p1 = pnand %p996_p0, %p984_p3  ;;  %p1004_p12 = scmp.lt.s32.totalorder %s1002_s11, %s995_s7 }
  0x24   : > { %p999_p2 = pneg %p998_p1  ;;  %p1005_p11 = por %p1004_p12, %p1003_p4 }
  0x26   : > { %p1006_p6 = pnand %p1005_p11, %p999_p2 }
  0x28   : > { %1009 = shalt.err (!%p1006_p6)
}
  0x29   : > { %930 = dma.hbm_to_vmem [thread:$0]  (!%p1186_p13), %s1182_s12, 512, %s1190_s14, %s190_s16  }
  0x2a   : > { %p1369_p9 = scmp.lt.s32.totalorder %s1074_s21, 3  ;;  %p1370_p7 = scmp.ge.s32.totalorder %s1074_s21, 1 }
  0x2c   : > { %p214_p0 = pnand %p1370_p7, %p1369_p9 }
  0x2d   : > { %s1217_s13 = sand.u32 (!%p214_p0), 1, %s1066_s19   ;;  %p1371_p6 = scmp.ne.s32.totalorder (!%p214_p0), %s1365_s29, 0 }
  0x2e   : > { %217 = sbr.rel (%p214_p0) target bundleno = 642 (0x282), region = 40  ;;  %s870_s17 = sshll.u32 (!%p214_p0), %s1217_s13, 5 }
  0x2f   : > { %s220_s23 = scalar_lea.sflag (!%p214_p0), [#allocation4], %s1217_s13  ;;  %s223_s25 = scalar_lea.vmem (!%p214_p0), [#allocation3], %s870_s17 }
  0x33   : > { %1053 = dma.done.wait (%p1371_p6), %s220_s23, 512  }
  0x34   : > { %1055 = vsyncadd (%p1371_p6), %s220_s23, 4294966784  ;;  %v1225_v0 = vld [vmem:[%s223_s25 + $0x8] sm:$0xff]  ;;  %v1227_v1 = vld [vmem:[%s223_s25] sm:$0xff]  ;;  %s1077_s12 = smov 90   ;;  %s1078_s14 = smov 91   ;;  %v1080_v3 = vmov 0.0  }
  0x35   : > { %397 = vrot.lane.b32.xlu0 %v1225_v0, %s1077_s12  ;;  %395 = vrot.lane.b32.xlu1 %v1227_v1, %s1077_s12  ;;  %v1231_v2 = vld [vmem:[%s223_s25 + $0x10] sm:$0xff]  ;;  %s1079_s29 = smov 92   ;;  %s1081_s15 = smov 108   ;;  %v261_v4 = vld [vmem:[%s223_s25 + $0x18] sm:$0xff]  ;;  %vm1086_vm0 = vmmov 0   ;;  %v1087_v5 = vmov 0  }
  0x36   : > { %895 = vmatprep.subr.mxu1 %v1080_v3  ;;  %515 = vmatprep.mubr.f32.mxu0 %v1080_v3  ;;  %s1082_s16 = smov 109   ;;  %s1083_s26 = smov 110   ;;  %v441_v6 = vld [vmem:[%s1358_s2] sm:$0xf]  ;;  %vm403_vm1 = vcmask 736256   ;;  %vm385_vm2 = vcmask 744448  }
  0x37   : > { %s1084_s28 = smov 126   ;;  %s1085_s8 = smov 127   ;;  %913 = vmatprep.mubr.msk.f32.mxu1 %vm1086_vm0, %v1080_v3  ;;  %980 = vset.pattern.permute.xlu0 %v1087_v5  ;;  %vm367_vm3 = vcmask 752640   ;;  %vm349_vm4 = vcmask 883712   ;;  %vm331_vm5 = vcmask 891904   ;;  %vm313_vm6 = vcmask 900096  }
  0x38   : > { %981 = vset.pattern.permute.xlu1 %v1087_v5  ;;  %vm295_vm7 = vcmask 1031168   ;;  %p254_p11 = scmp.lt.s32.totalorder %s1140_s22, 1  ;;  %vm277_vm8 = vcmask 1039360   ;;  %vm447_vm9 = vcmask 588800   ;;  %vm609_vm10 = vcmask 1043456   ;;  %p1372_p13 = scmp.ne.s32.totalorder %s1366_s30, 0 }
  0x39   : > { %399 = vrot.lane.b32.xlu0 %v1231_v2, %s1077_s12  ;;  %379 = vrot.lane.b32.xlu1 %v1225_v0, %s1078_s14  ;;  %vm605_vm11 = vcmask 31744  }
  0x3a   : > { %s255_s10 = scalar_select %p254_p11, %s1140_s22, 1 }
  0x3c   : > { %s871_s11 = sshll.u32 %s255_s10, 2 }
  0x3d   : > { %381 = vrot.lane.b32.xlu0 %v1231_v2, %s1078_s14  ;;  %377 = vrot.lane.b32.xlu1 %v1227_v1, %s1078_s14  ;;  %s257_s25 = scalar_lea.vmem %s1357_s1, %s871_s11  ;;  %s767_s11 = scalar_lea.sflag [#allocation5], %s1217_s13 }
  0x3e   : > { %v413_v55 = vld [vmem:[%s257_s25] sm:$0xf] }
  0x41   : > { %361 = vrot.lane.b32.xlu0 %v1225_v0, %s1079_s29  ;;  %363 = vrot.lane.b32.xlu1 %v1231_v2, %s1079_s29 }
  0x45   : > { %359 = vrot.lane.b32.xlu0 %v1227_v1, %s1079_s29  ;;  %343 = vrot.lane.b32.xlu1 %v1225_v0, %s1081_s15 }
  0x49   : > { %345 = vrot.lane.b32.xlu0 %v1231_v2, %s1081_s15  ;;  %341 = vrot.lane.b32.xlu1 %v1227_v1, %s1081_s15 }
  0x4d   : > { %325 = vrot.lane.b32.xlu0 %v1225_v0, %s1082_s16  ;;  %327 = vrot.lane.b32.xlu1 %v1231_v2, %s1082_s16 }
  0x51   : > { %401 = vrot.lane.b32.xlu0 %v261_v4, %s1077_s12  ;;  %323 = vrot.lane.b32.xlu1 %v1227_v1, %s1082_s16 }
  0x55   : > { %307 = vrot.lane.b32.xlu0 %v1225_v0, %s1083_s26  ;;  %309 = vrot.lane.b32.xlu1 %v1231_v2, %s1083_s26 }
  0x59   : > { %383 = vrot.lane.b32.xlu0 %v261_v4, %s1078_s14  ;;  %305 = vrot.lane.b32.xlu1 %v1227_v1, %s1083_s26 }
  0x5d   : > { %289 = vrot.lane.b32.xlu0 %v1225_v0, %s1084_s28  ;;  %291 = vrot.lane.b32.xlu1 %v1231_v2, %s1084_s28 }
  0x61   : > { %365 = vrot.lane.b32.xlu0 %v261_v4, %s1079_s29  ;;  %287 = vrot.lane.b32.xlu1 %v1227_v1, %s1084_s28 }
  0x65   : > { %271 = vrot.lane.b32.xlu0 %v1225_v0, %s1085_s8  ;;  %273 = vrot.lane.b32.xlu1 %v1231_v2, %s1085_s8 }
  0x69   : > { %347 = vrot.lane.b32.xlu0 %v261_v4, %s1081_s15  ;;  %269 = vrot.lane.b32.xlu1 %v1227_v1, %s1085_s8 }
  0x6d   : > { %329 = vrot.lane.b32.xlu0 %v261_v4, %s1082_s16  ;;  %311 = vrot.lane.b32.xlu1 %v261_v4, %s1083_s26  ;;  %s921_s16 = smul.u32 12, %s1217_s13 }
  0x6e   : > { %s922_s26 = smul.u32 192, %s1140_s22  ;;  %s1088_s22 = smov [#allocation6]  }
  0x6f   : > { %s1014_s23 = sshll.u32 %s1088_s22, 4  ;;  %s1015_s23 = int_to_ptr.vmem [resolvable:$false] %s1014_s23 }
  0x70   : > { %s1319_s10 = scalar_lea.hbm %s1361_s5, %s922_s26  ;;  %s1016_s25 = scalar_lea.vmem %s1015_s23, 384 }
  0x71   : > { %293 = vrot.lane.b32.xlu0 %v261_v4, %s1084_s28  ;;  %275 = vrot.lane.b32.xlu1 %v261_v4, %s1085_s8  ;;  %s253_s28 = scalar_lea.vmem [#allocation6], %s921_s16 }
  0x72   : > { %s781_s8 = sshll.u32 %s253_s28, 4  ;;  %s782_s8 = int_to_ptr.vmem [resolvable:$true] %s781_s8 }
  0x73   : > { %s1010_s17 = scalar_lea.vmem %s782_s8, 192  ;;  %p1017_p5 = scmp.lt.s32.totalorder %s782_s8, %s1015_s23 }
  0x74   : > { %p1011_p12 = scmp.ne.s32.totalorder %s782_s8, %s1010_s17  ;;  %p1018_p8 = scmp.lt.s32.totalorder %s1016_s25, %s1010_s17 }
  0x75   : > { %444 = vperm.xlu0 %980, %v441_v6  }
  0x76   : > { %p1012_p1 = pnand %p1011_p12, %p1372_p13  ;;  %p1019_p10 = por %p1018_p8, %p1017_p5 }
  0x78   : > { %p1013_p3 = pneg %p1012_p1 }
  0x7a   : > { %p1020_p2 = pnand %p1019_p10, %p1013_p3 }
  0xa7   : > { %v398_v7 = vpop.permute.xlu0 %397  ;;  %v396_v8 = vpop.permute.xlu1 %395 }
  0xa8   : > { %v404_v12 = vsel %vm403_vm1, %v396_v8, %v398_v7 }
  0xab   : > { %v400_v9 = vpop.permute.xlu0 %399  ;;  %v380_v10 = vpop.permute.xlu1 %379 }
  0xac   : > { %v405_v11 = vsel %vm403_vm1, %v398_v7, %v400_v9 }
  0xad   : > { %465 = vmatprep.subr.mxu0 %v405_v11 }
  0xae   : > { %466 = vmatpush1.msra.mxu0 %v404_v12 }
  0xaf   : > { %v382_v13 = vpop.permute.xlu0 %381  ;;  %v378_v14 = vpop.permute.xlu1 %377 }
  0xb0   : > { %v387_v15 = vsel %vm385_vm2, %v380_v10, %v382_v13  ;;  %v386_v16 = vsel %vm385_vm2, %v378_v14, %v380_v10 }
  0xb1   : > { %467 = vmatprep.subr.mxu0 %v387_v15 }
  0xb2   : > { %468 = vmatpush1.msra.mxu0 %v386_v16 }
  0xb3   : > { %v362_v17 = vpop.permute.xlu0 %361  ;;  %v364_v18 = vpop.permute.xlu1 %363 }
  0xb4   : > { %v369_v19 = vsel %vm367_vm3, %v362_v17, %v364_v18 }
  0xb5   : > { %469 = vmatprep.subr.mxu0 %v369_v19 }
  0xb7   : > { %v360_v20 = vpop.permute.xlu0 %359  ;;  %v344_v21 = vpop.permute.xlu1 %343 }
  0xb8   : > { %v368_v22 = vsel %vm367_vm3, %v360_v20, %v362_v17 }
  0xb9   : > { %470 = vmatpush1.msra.mxu0 %v368_v22 }
  0xbb   : > { %v346_v23 = vpop.permute.xlu0 %345  ;;  %v342_v24 = vpop.permute.xlu1 %341 }
  0xbc   : > { %v351_v25 = vsel %vm349_vm4, %v344_v21, %v346_v23  ;;  %v350_v26 = vsel %vm349_vm4, %v342_v24, %v344_v21 }
  0xbd   : > { %471 = vmatprep.subr.mxu0 %v351_v25 }
  0xbe   : > { %472 = vmatpush1.msra.mxu0 %v350_v26 }
  0xbf   : > { %v326_v27 = vpop.permute.xlu0 %325  ;;  %v328_v28 = vpop.permute.xlu1 %327 }
  0xc0   : > { %v333_v29 = vsel %vm331_vm5, %v326_v27, %v328_v28 }
  0xc1   : > { %473 = vmatprep.subr.mxu0 %v333_v29 }
  0xc3   : > { %v402_v30 = vpop.permute.xlu0 %401  ;;  %v324_v31 = vpop.permute.xlu1 %323 }
  0xc4   : > { %v332_v32 = vsel %vm331_vm5, %v324_v31, %v326_v27  ;;  %v406_v33 = vsel %vm403_vm1, %v400_v9, %v402_v30 }
  0xc5   : > { %474 = vmatpush1.msra.mxu0 %v332_v32  ;;  %896 = vmatpush3.msra.mxu1 %v406_v33 }
  0xc6   : > { %897 = vmatprep.subr.mxu1 %v1080_v3 }
  0xc7   : > { %v308_v34 = vpop.permute.xlu0 %307  ;;  %v310_v35 = vpop.permute.xlu1 %309 }
  0xc8   : > { %v315_v36 = vsel %vm313_vm6, %v308_v34, %v310_v35 }
  0xc9   : > { %475 = vmatprep.subr.mxu0 %v315_v36 }
  0xcb   : > { %v384_v37 = vpop.permute.xlu0 %383  ;;  %v306_v38 = vpop.permute.xlu1 %305 }
  0xcc   : > { %v314_v39 = vsel %vm313_vm6, %v306_v38, %v308_v34  ;;  %v388_v40 = vsel %vm385_vm2, %v382_v13, %v384_v37 }
  0xcd   : > { %476 = vmatpush1.msra.mxu0 %v314_v39  ;;  %898 = vmatpush3.msra.mxu1 %v388_v40 }
  0xce   : > { %899 = vmatprep.subr.mxu1 %v1080_v3 }
  0xcf   : > { %v290_v41 = vpop.permute.xlu0 %289  ;;  %v292_v42 = vpop.permute.xlu1 %291 }
  0xd0   : > { %v297_v43 = vsel %vm295_vm7, %v290_v41, %v292_v42 }
  0xd1   : > { %477 = vmatprep.subr.mxu0 %v297_v43 }
  0xd3   : > { %v366_v44 = vpop.permute.xlu0 %365  ;;  %v288_v45 = vpop.permute.xlu1 %287 }
  0xd4   : > { %v296_v46 = vsel %vm295_vm7, %v288_v45, %v290_v41  ;;  %v370_v47 = vsel %vm367_vm3, %v364_v18, %v366_v44 }
  0xd5   : > { %478 = vmatpush1.msra.mxu0 %v296_v46  ;;  %900 = vmatpush3.msra.mxu1 %v370_v47 }
  0xd6   : > { %901 = vmatprep.subr.mxu1 %v1080_v3 }
  0xd7   : > { %v272_v48 = vpop.permute.xlu0 %271  ;;  %v274_v49 = vpop.permute.xlu1 %273 }
  0xd8   : > { %v279_v50 = vsel %vm277_vm8, %v272_v48, %v274_v49 }
  0xd9   : > { %479 = vmatprep.subr.mxu0 %v279_v50 }
  0xdb   : > { %v348_v51 = vpop.permute.xlu0 %347  ;;  %v270_v52 = vpop.permute.xlu1 %269 }
  0xdc   : > { %v278_v53 = vsel %vm277_vm8, %v270_v52, %v272_v48  ;;  %v352_v54 = vsel %vm349_vm4, %v346_v23, %v348_v51 }
  0xdd   : > { %480 = vmatpush1.msra.mxu0 %v278_v53  ;;  %902 = vmatpush3.msra.mxu1 %v352_v54 }
  0xde   : > { %481 = vmatprep.subr.mxu0 %v1225_v0  ;;  %903 = vmatprep.subr.mxu1 %v1080_v3  ;;  %v599_v0 = vld [vmem:[%s1360_s4] sm:$0xf] }
  0xdf   : > { %v330_v56 = vpop.permute.xlu0 %329  ;;  %482 = vmatpush1.msra.mxu0 %v1227_v1  ;;  %v312_v57 = vpop.permute.xlu1 %311  ;;  %602 = vperm.xlu1 %981, %v599_v0  }
  0xe0   : > { %872 = vmatmul.mubr.msk.f32.vlgmr.msra.gmra.mxu0 %vm447_vm9, %v413_v55  ;;  %v334_v58 = vsel %vm331_vm5, %v328_v28, %v330_v56  ;;  %v316_v59 = vsel %vm313_vm6, %v310_v35, %v312_v57 }
  0xe1   : > { %904 = vmatpush3.msra.mxu1 %v334_v58  ;;  %683 = vmatprep.mubr.f32.mxu0 %v1080_v3 }
  0xe2   : > { %905 = vmatprep.subr.mxu1 %v1080_v3 }
  0xe3   : > { %v294_v60 = vpop.permute.xlu0 %293  ;;  %906 = vmatpush3.msra.mxu1 %v316_v59  ;;  %v276_v61 = vpop.permute.xlu1 %275 }
  0xe4   : > { %907 = vmatprep.subr.mxu1 %v1080_v3  ;;  %v298_v62 = vsel %vm295_vm7, %v292_v42, %v294_v60  ;;  %v280_v63 = vsel %vm277_vm8, %v274_v49, %v276_v61 }
  0xe5   : > { %908 = vmatpush3.msra.mxu1 %v298_v62 }
  0xe6   : > { %909 = vmatprep.subr.mxu1 %v1080_v3 }
  0xe7   : > { %910 = vmatpush3.msra.mxu1 %v280_v63 }
  0xe8   : > { %911 = vmatprep.subr.mxu1 %v1080_v3 }
  0xe9   : > { %912 = vmatpush3.msra.mxu1 %v1231_v2 }
  0xea   : > { %914 = vmatmul.mubr.msk.f32.vlgmr.msra.gmra.mxu1 %vm447_vm9, %v413_v55  ;;  %916 = vmatprep.subr.mxu1 %v1080_v3 }
  0xeb   : > { %918 = vmatprep.mubr.msk.f32.mxu1 %vm1086_vm0, %v1080_v3  ;;  %v598_v3 = vld [vmem:[%s1359_s3] sm:$0xf] }
  0xf0   : > { %v445_v1 = vpop.permute.xlu0 %444 }
 0x15a   : > { %v603_v16 = vpop.permute.xlu1 %602 }
 0x1a0   : > { %v517_v4 = vpop.f32.mrf.mxu0 }
 0x1a1   : > { %v518_v5 = vadd.f32 %v517_v4, %v445_v1 }
 0x1a2   : > { %v519_v6 = vpop.f32.mrf.mxu0 }
 0x1a3   : > { %v520_v7 = vadd.f32 %v519_v6, %v445_v1  ;;  %v592_v8 = vmul.f32 0.2, %v518_v5 }
 0x1a5   : > { %v593_v9 = vmul.f32 0.2, %v520_v7  ;;  %v595_v10 = vmax.f32 %v518_v5, %v592_v8 }
 0x1a7   : > { %v596_v2 = vmax.f32 %v520_v7, %v593_v9 }
 0x1a9   : > { %874 = vmatprep.subr.msk.mxu0 %vm609_vm10, %v596_v2 }
 0x1aa   : > { %v588_v11 = vpop.f32.mrf.mxu1  ;;  %875 = vmatpush1.msk.msra.mxu0 %vm609_vm10, %v595_v10 }
 0x1ab   : > { %v589_v12 = vadd.f32 %v588_v11, %v445_v1  ;;  %876 = vmatmul.mubr.msk.f32.vlgmr.msra.gmra.mxu0 %vm605_vm11, %v598_v3 }
 0x1ac   : > { %v915_v13 = vpop.f32.mrf.mxu1 }
 0x1ad   : > { %v594_v14 = vmul.f32 0.2, %v589_v12 }
 0x1af   : > { %v597_v15 = vmax.f32 %v589_v12, %v594_v14 }
 0x1b1   : > { %917 = vmatpush3.msk.msra.mxu1 %vm609_vm10, %v597_v15 }
 0x1b2   : > { %919 = vmatmul.mubr.msk.f32.vlgmr.msra.gmra.mxu1 %vm605_vm11, %v598_v3 }
 0x26b   : > { %v685_v17 = vpop.f32.mrf.mxu0 }
 0x26c   : > { %v686_v18 = vadd.f32 %v685_v17, %v603_v16 }
 0x26d   : > { %v687_v19 = vpop.f32.mrf.mxu0 }
 0x26e   : > { %v688_v20 = vadd.f32 %v687_v19, %v603_v16 }
 0x270   : > { %v762_v21 = vcombine.low %v686_v18, %v688_v20 }
 0x272   : > { %v756_v22 = vpop.f32.mrf.mxu1  ;;  %764 = vst [vmem:[%s253_s28] sm:$0xff] %v762_v21 }
 0x273   : > { %v757_v23 = vadd.f32 %v756_v22, %v603_v16 }
 0x274   : > { %v920_v24 = vpop.f32.mrf.mxu1 }
 0x275   : > { %765 = vst [vmem:[%s253_s28 + $0x8] sm:$0xf] %v757_v23 }
 0x276   : > { %1023 = shalt.err (!%p1020_p2)
}
 0x277   : > { %s1024_s12 = scalar_lea.hbm %s1319_s10, 192  ;;  %s1028_s29 = scalar_lea.hbm %s1361_s5, 384 }
 0x278   : > { %p1025_p4 = scmp.ne.s32.totalorder %s1319_s10, %s1024_s12  ;;  %p1029_p0 = scmp.lt.s32.totalorder %s1319_s10, %s1361_s5 }
 0x279   : > { %p1030_p6 = scmp.lt.s32.totalorder %s1028_s29, %s1024_s12 }
 0x27a   : > { %p1026_p9 = pnand %p1025_p4, %p1372_p13 }
 0x27b   : > { %p1031_p11 = por %p1030_p6, %p1029_p0 }
 0x27c   : > { %p1027_p7 = pneg %p1026_p9 }
 0x27e   : > { %p1032_p12 = pnand %p1031_p11, %p1027_p7 }
 0x280   : > { %1035 = shalt.err (!%p1032_p12)
}
 0x281   : > { %925 = dma.vmem_to_hbm [thread:$0]  (%p1372_p13), %s782_s8, 192, %s1319_s10, %s767_s11  }
 0x282 PF: > { %s793_s26 = sand.u32 1, %s1062_s18   ;;  %p1373_p1 = scmp.ne.s32.totalorder %s1367_s6, 0 }
 0x283   : > { %p1374_p3 = scmp.ge.s32.totalorder %s1074_s21, 2  ;;  %s794_s28 = scalar_lea.sflag [#allocation5], %s793_s26 }
 0x285   : > { %p932_p5 = pnand %p1374_p3, %p1373_p1 }
 0x287   : > { %p933_p8 = pneg %p932_p5 }
 0x289   : > { %1057 = dma.done.wait (%p933_p8), %s794_s28, 192  }
 0x28a   : > { %1059 = vsyncadd (%p933_p8), %s794_s28, 4294967104  ;;  %p18_p10 = scmp.ge.s32.totalorder %s1144_s24, 4   ;;  %s1375_s18 = smov %s1066_s19 }
 0x28b   : > { %s1376_s19 = smov %s1070_s20  ;;  %s1377_s20 = smov %s1156_s27 }
 0x28c   : > { %s1378_s21 = smov %s1144_s24  ;;  %20 = sbr.rel (!%p18_p10) target bundleno = 5 (0x5), region = 88 }
 0x291   :  { %799 = vsyncpa [#allocation4], 1 }
 0x292   :  { %801 = vsyncpa [#allocation4 + $0x1], 1 }
 0x293   :  { %802 = vsyncpa [#allocation5], 1 }
 0x294   :  { %804 = vsyncpa [#allocation5 + $0x1], 1 }

</bundles_post_ra>
